<compile_context>
chip_gen: v7x
topology: tpu7x:2x2x1
jax: 0.10.0
libtpu: 0.0.40
codegen_flags: <defaults>
</compile_context>

<pallas_src>
import jax
import jax.numpy as jnp
from jax.experimental import pallas as pl
from jax.experimental.pallas import tpu as pltpu

IN_DIM, HIDDEN1, HIDDEN2, OUT_DIM = 4, 15, 8, 3
H1_PAD = 16   # hidden1 padded 15 -> 16 (zero pad => extra unit is exactly 0)
OUT_PAD = 8   # fc3 output padded 3 -> 8 for an aligned MXU N; sliced in-kernel

_SMALL_BATCH = 1024   # below this, a single block beats any tiling


def _round_up(n, m):
    return ((n + m - 1) // m) * m


def _choose_bb(B, block_b):
    if B <= _SMALL_BATCH:
        # Small-batch (iris-sized) regime: one block, no pipeline overhead,
        # and no padding copy at all when B is already a multiple of 8.
        return _round_up(B, 8)
    # Tiled path: at least 2 batch blocks so v7x's two TensorCores both get
    # work, capped at block_b to bound per-step VMEM (~3 KiB/sample here).
    half = _round_up(pl.cdiv(B, 2), 256)
    return max(256, min(_round_up(block_b, 256), half))


def mlp_kernel(x_ref, w1_ref, b1_ref, w2_ref, b2_ref, w3_ref, b3_ref, o_ref):
    # x_ref : (bb, 4)   natural batch-major block
    # w1_ref: (4, 16)   fc1 weight transposed, hidden padded 15->16 with zeros
    # b1_ref: (1, 16)   fc1 bias (padded entry is zero)
    # w2_ref: (16, 8)   fc2 weight transposed (padded input row is zero)
    # b2_ref: (1, 8)
    # w3_ref: (8, 8)    fc3 weight transposed, output padded 3->8 with zeros
    # b3_ref: (1, 3)
    # o_ref : (bb, 3)   final logits, written directly in PyTorch layout
    x = x_ref[...]

    # Layer 1 on the VPU: 4 broadcast FMAs (a K=4 matmul would waste >95% of
    # the MXU).  Zero-padded column 15 stays exactly 0 through the ReLU.
    h1 = b1_ref[...]
    h1 = h1 + x[:, 0:1] * w1_ref[0:1, :]
    h1 = h1 + x[:, 1:2] * w1_ref[1:2, :]
    h1 = h1 + x[:, 2:3] * w1_ref[2:3, :]
    h1 = h1 + x[:, 3:4] * w1_ref[3:4, :]
    h1 = jnp.maximum(h1, 0.0)

    # Layers 2 and 3 on the MXU, weight-stationary (tiny RHS), batch streaming
    # on sublanes; f32 accumulation.
    h2 = jnp.dot(h1, w2_ref[...], preferred_element_type=jnp.float32) + b2_ref[...]
    h2 = jnp.maximum(h2, 0.0)
    y8 = jnp.dot(h2, w3_ref[...], preferred_element_type=jnp.float32)   # (bb, 8)
    o_ref[...] = (y8[:, 0:OUT_DIM] + b3_ref[...]).astype(o_ref.dtype)


def prep_params(params):
    """Transpose PyTorch-layout (out,in) weights to (in,out) and zero-pad the
    ragged dims (15->16 hidden, 3->8 output).  Zero padding keeps padded units
    exactly 0 so they never contribute to later layers."""
    f32 = jnp.float32
    w1t = jnp.zeros((IN_DIM, H1_PAD), f32).at[:, :HIDDEN1].set(params["w1"].T.astype(f32))
    b1 = jnp.zeros((1, H1_PAD), f32).at[0, :HIDDEN1].set(params["b1"].astype(f32))
    w2t = jnp.zeros((H1_PAD, HIDDEN2), f32).at[:HIDDEN1, :].set(params["w2"].T.astype(f32))
    b2 = params["b2"].astype(f32).reshape(1, HIDDEN2)
    w3t = jnp.zeros((HIDDEN2, OUT_PAD), f32).at[:, :OUT_DIM].set(params["w3"].T.astype(f32))
    b3 = params["b3"].astype(f32).reshape(1, OUT_DIM)
    return w1t, b1, w2t, b2, w3t, b3


def net_forward(x, params, *, block_b=4096):
    """x: (B, 4) float32 (natural layout). params: PyTorch-layout dict
    (w*: (out,in), b*: (out,)).  Returns (B, 3) logits."""
    B = x.shape[0]
    x = x.astype(jnp.float32)
    bb = _choose_bb(B, block_b)
    B_pad = _round_up(B, bb)
    # Only wrapper op: zero-pad the ragged batch tail (skipped when aligned).
    x_in = x if B_pad == B else jnp.zeros((B_pad, IN_DIM), jnp.float32).at[:B].set(x)

    w1t, b1, w2t, b2, w3t, b3 = prep_params(params)
    const = lambda i: (0, 0)   # resident parameter blocks (fetched once)

    out = pl.pallas_call(
        mlp_kernel,
        out_shape=jax.ShapeDtypeStruct((B_pad, OUT_DIM), jnp.float32),
        grid=(B_pad // bb,),
        in_specs=[
            pl.BlockSpec((bb, IN_DIM), lambda i: (i, 0)),     # natural-layout batch block
            pl.BlockSpec((IN_DIM, H1_PAD), const),
            pl.BlockSpec((1, H1_PAD), const),
            pl.BlockSpec((H1_PAD, HIDDEN2), const),
            pl.BlockSpec((1, HIDDEN2), const),
            pl.BlockSpec((HIDDEN2, OUT_PAD), const),
            pl.BlockSpec((1, OUT_DIM), const),
        ],
        out_specs=pl.BlockSpec((bb, OUT_DIM), lambda i: (i, 0)),
        compiler_params=pltpu.CompilerParams(
            dimension_semantics=("parallel",),   # v7x: the 2 TCs split the batch blocks
            vmem_limit_bytes=32 * 1024 * 1024,   # headroom over v5e's 16 MiB default
        ),
    )(x_in, w1t, b1, w2t, b2, w3t, b3)

    return out if B_pad == B else out[:B]


def init_params(key):
    """PyTorch nn.Linear default init: U(-1/sqrt(fan_in), 1/sqrt(fan_in)),
    weights stored (out_features, in_features) exactly like PyTorch."""
    def linear_init(k, fan_in, fan_out):
        kw, kb = jax.random.split(k)
        bound = 1.0 / jnp.sqrt(fan_in)
        w = jax.random.uniform(kw, (fan_out, fan_in), jnp.float32, -bound, bound)
        b = jax.random.uniform(kb, (fan_out,), jnp.float32, -bound, bound)
        return w, b

    k1, k2, k3 = jax.random.split(key, 3)
    w1, b1 = linear_init(k1, IN_DIM, HIDDEN1)
    w2, b2 = linear_init(k2, HIDDEN1, HIDDEN2)
    w3, b3 = linear_init(k3, HIDDEN2, OUT_DIM)
    return {"w1": w1, "b1": b1, "w2": w2, "b2": b2, "w3": w3, "b3": b3}


def net_forward_ref(x, params):
    """Pure-JAX reference matching the PyTorch forward (x @ W.T + b)."""
    h1 = jnp.maximum(x @ params["w1"].T + params["b1"], 0.0)
    h2 = jnp.maximum(h1 @ params["w2"].T + params["b2"], 0.0)
    return h2 @ params["w3"].T + params["b3"]


if __name__ == "__main__":
    key = jax.random.PRNGKey(0)
    kx, kp, kx2 = jax.random.split(key, 3)
    params = init_params(kp)

    # Tolerance covers XLA's default TPU matmul precision (possibly 1-pass
    # bf16) in the reference vs the exact-f32 VPU first layer in the kernel.
    TOL = 1e-2

    # Small (iris-sized) batch: single block, grid=(1,), zero wrapper copies.
    B = 8
    x = jax.random.normal(kx, (B, IN_DIM), jnp.float32)
    out = jax.block_until_ready(net_forward(x, params))
    ref = net_forward_ref(x, params)
    assert out.shape == (B, OUT_DIM)
    assert jnp.allclose(out, ref, atol=TOL, rtol=TOL), "small-batch mismatch vs reference"

    # Larger ragged batch: exercises the tiled 2-block "parallel" path + row padding.
    B2 = 3000
    x2 = jax.random.normal(kx2, (B2, IN_DIM), jnp.float32)
    out2 = jax.block_until_ready(net_forward(x2, params))
    ref2 = net_forward_ref(x2, params)
    assert out2.shape == (B2, OUT_DIM)
    assert jnp.allclose(out2, ref2, atol=TOL, rtol=TOL), "tiled-batch mismatch vs reference"

    print("KERNEL_OK")
</pallas_src>

<mosaic_0001>
module attributes {stable_mosaic.version = 11 : i64} {
  func.func @mlp_kernel(%arg0: i32, %arg1: memref<8x4xf32, #tpu.memory_space<vmem>>, %arg2: memref<4x16xf32, #tpu.memory_space<vmem>>, %arg3: memref<1x16xf32, #tpu.memory_space<vmem>>, %arg4: memref<16x8xf32, #tpu.memory_space<vmem>>, %arg5: memref<1x8xf32, #tpu.memory_space<vmem>>, %arg6: memref<8x8xf32, #tpu.memory_space<vmem>>, %arg7: memref<1x3xf32, #tpu.memory_space<vmem>>, %arg8: memref<8x3xf32, #tpu.memory_space<vmem>>) attributes {dimension_semantics = [#tpu.dimension_semantics<parallel>], iteration_bounds = array<i64: 1>, scalar_prefetch = 0 : i64, scratch_operands = 0 : i64, tpu.core_type = #tpu.core_type<tc>, window_params = [{transform_indices = @transform_0, window_bounds = array<i64: 8, 4>}, {pipeline_mode = #tpu.pipeline_mode<synchronous>, transform_indices = @transform_1, window_bounds = array<i64: 4, 16>}, {pipeline_mode = #tpu.pipeline_mode<synchronous>, transform_indices = @transform_2, window_bounds = array<i64: 1, 16>}, {pipeline_mode = #tpu.pipeline_mode<synchronous>, transform_indices = @transform_3, window_bounds = array<i64: 16, 8>}, {pipeline_mode = #tpu.pipeline_mode<synchronous>, transform_indices = @transform_4, window_bounds = array<i64: 1, 8>}, {pipeline_mode = #tpu.pipeline_mode<synchronous>, transform_indices = @transform_5, window_bounds = array<i64: 8, 8>}, {pipeline_mode = #tpu.pipeline_mode<synchronous>, transform_indices = @transform_6, window_bounds = array<i64: 1, 3>}, {transform_indices = @transform_7, window_bounds = array<i64: 8, 3>}]} {
    %c0 = arith.constant 0 : index
    %c0_0 = arith.constant 0 : index
    %0 = vector.load %arg1[%c0, %c0_0] : memref<8x4xf32, #tpu.memory_space<vmem>>, vector<8x4xf32>
    %c0_1 = arith.constant 0 : index
    %c0_2 = arith.constant 0 : index
    %1 = vector.load %arg3[%c0_1, %c0_2] : memref<1x16xf32, #tpu.memory_space<vmem>>, vector<1x16xf32>
    %2 = vector.extract_strided_slice %0 {offsets = [0, 0], sizes = [8, 1], strides = [1, 1]} : vector<8x4xf32> to vector<8x1xf32>
    %c0_3 = arith.constant 0 : index
    %c0_4 = arith.constant 0 : index
    %3 = vector.load %arg2[%c0_3, %c0_4] : memref<4x16xf32, #tpu.memory_space<vmem>>, vector<1x16xf32>
    %4 = vector.broadcast %2 : vector<8x1xf32> to vector<8x16xf32>
    %5 = vector.broadcast %3 : vector<1x16xf32> to vector<8x16xf32>
    %6 = arith.mulf %4, %5 : vector<8x16xf32>
    %7 = vector.broadcast %1 : vector<1x16xf32> to vector<8x16xf32>
    %8 = arith.addf %7, %6 : vector<8x16xf32>
    %9 = vector.extract_strided_slice %0 {offsets = [0, 1], sizes = [8, 1], strides = [1, 1]} : vector<8x4xf32> to vector<8x1xf32>
    %c1 = arith.constant 1 : index
    %c0_5 = arith.constant 0 : index
    %10 = vector.load %arg2[%c1, %c0_5] : memref<4x16xf32, #tpu.memory_space<vmem>>, vector<1x16xf32>
    %11 = vector.broadcast %9 : vector<8x1xf32> to vector<8x16xf32>
    %12 = vector.broadcast %10 : vector<1x16xf32> to vector<8x16xf32>
    %13 = arith.mulf %11, %12 : vector<8x16xf32>
    %14 = arith.addf %8, %13 : vector<8x16xf32>
    %15 = vector.extract_strided_slice %0 {offsets = [0, 2], sizes = [8, 1], strides = [1, 1]} : vector<8x4xf32> to vector<8x1xf32>
    %c2 = arith.constant 2 : index
    %c0_6 = arith.constant 0 : index
    %16 = vector.load %arg2[%c2, %c0_6] : memref<4x16xf32, #tpu.memory_space<vmem>>, vector<1x16xf32>
    %17 = vector.broadcast %15 : vector<8x1xf32> to vector<8x16xf32>
    %18 = vector.broadcast %16 : vector<1x16xf32> to vector<8x16xf32>
    %19 = arith.mulf %17, %18 : vector<8x16xf32>
    %20 = arith.addf %14, %19 : vector<8x16xf32>
    %21 = vector.extract_strided_slice %0 {offsets = [0, 3], sizes = [8, 1], strides = [1, 1]} : vector<8x4xf32> to vector<8x1xf32>
    %c3 = arith.constant 3 : index
    %c0_7 = arith.constant 0 : index
    %22 = vector.load %arg2[%c3, %c0_7] : memref<4x16xf32, #tpu.memory_space<vmem>>, vector<1x16xf32>
    %23 = vector.broadcast %21 : vector<8x1xf32> to vector<8x16xf32>
    %24 = vector.broadcast %22 : vector<1x16xf32> to vector<8x16xf32>
    %25 = arith.mulf %23, %24 : vector<8x16xf32>
    %26 = arith.addf %20, %25 : vector<8x16xf32>
    %cst = arith.constant 0.000000e+00 : f32
    %27 = vector.broadcast %cst : f32 to vector<8x16xf32>
    %28 = arith.maximumf %26, %27 : vector<8x16xf32>
    %c0_8 = arith.constant 0 : index
    %c0_9 = arith.constant 0 : index
    %29 = vector.load %arg4[%c0_8, %c0_9] : memref<16x8xf32, #tpu.memory_space<vmem>>, vector<16x8xf32>
    %cst_10 = arith.constant dense<0.000000e+00> : vector<8x8xf32>
    %30 = tpu.matmul %28, %29, %cst_10 {dimension_numbers = #tpu.dot_dimension_numbers<[1], [0], [0], [1], [0, 0, 1, 1], [], []>} : vector<8x16xf32>, vector<16x8xf32>, vector<8x8xf32> -> vector<8x8xf32>
    %c0_11 = arith.constant 0 : index
    %c0_12 = arith.constant 0 : index
    %31 = vector.load %arg5[%c0_11, %c0_12] : memref<1x8xf32, #tpu.memory_space<vmem>>, vector<1x8xf32>
    %32 = vector.broadcast %31 : vector<1x8xf32> to vector<8x8xf32>
    %33 = arith.addf %30, %32 : vector<8x8xf32>
    %cst_13 = arith.constant 0.000000e+00 : f32
    %34 = vector.broadcast %cst_13 : f32 to vector<8x8xf32>
    %35 = arith.maximumf %33, %34 : vector<8x8xf32>
    %c0_14 = arith.constant 0 : index
    %c0_15 = arith.constant 0 : index
    %36 = vector.load %arg6[%c0_14, %c0_15] : memref<8x8xf32, #tpu.memory_space<vmem>>, vector<8x8xf32>
    %cst_16 = arith.constant dense<0.000000e+00> : vector<8x8xf32>
    %37 = tpu.matmul %35, %36, %cst_16 {dimension_numbers = #tpu.dot_dimension_numbers<[1], [0], [0], [1], [0, 0, 1, 1], [], []>} : vector<8x8xf32>, vector<8x8xf32>, vector<8x8xf32> -> vector<8x8xf32>
    %38 = vector.extract_strided_slice %37 {offsets = [0, 0], sizes = [8, 3], strides = [1, 1]} : vector<8x8xf32> to vector<8x3xf32>
    %c0_17 = arith.constant 0 : index
    %c0_18 = arith.constant 0 : index
    %39 = vector.load %arg7[%c0_17, %c0_18] : memref<1x3xf32, #tpu.memory_space<vmem>>, vector<1x3xf32>
    %40 = vector.broadcast %39 : vector<1x3xf32> to vector<8x3xf32>
    %41 = arith.addf %38, %40 : vector<8x3xf32>
    %c0_19 = arith.constant 0 : index
    %c0_20 = arith.constant 0 : index
    %42 = vector.load %arg8[%c0_19, %c0_20] : memref<8x3xf32, #tpu.memory_space<vmem>>, vector<8x3xf32>
    tpu.vector_store %arg8[%c0_19, %c0_20], %41 {strides = array<i32>} : memref<8x3xf32, #tpu.memory_space<vmem>>, vector<8x3xf32>,
    return
  }
  func.func @transform_0(%arg0: i32) -> (i32, i32) {
    %c0_i32 = arith.constant 0 : i32
    %c0_i32_0 = arith.constant 0 : i32
    return %arg0, %c0_i32 : i32, i32
  }
  func.func @transform_1(%arg0: i32) -> (i32, i32) {
    %c0_i32 = arith.constant 0 : i32
    %c0_i32_0 = arith.constant 0 : i32
    %c0_i32_1 = arith.constant 0 : i32
    return %c0_i32, %c0_i32_0 : i32, i32
  }
  func.func @transform_2(%arg0: i32) -> (i32, i32) {
    %c0_i32 = arith.constant 0 : i32
    %c0_i32_0 = arith.constant 0 : i32
    %c0_i32_1 = arith.constant 0 : i32
    return %c0_i32, %c0_i32_0 : i32, i32
  }
  func.func @transform_3(%arg0: i32) -> (i32, i32) {
    %c0_i32 = arith.constant 0 : i32
    %c0_i32_0 = arith.constant 0 : i32
    %c0_i32_1 = arith.constant 0 : i32
    return %c0_i32, %c0_i32_0 : i32, i32
  }
  func.func @transform_4(%arg0: i32) -> (i32, i32) {
    %c0_i32 = arith.constant 0 : i32
    %c0_i32_0 = arith.constant 0 : i32
    %c0_i32_1 = arith.constant 0 : i32
    return %c0_i32, %c0_i32_0 : i32, i32
  }
  func.func @transform_5(%arg0: i32) -> (i32, i32) {
    %c0_i32 = arith.constant 0 : i32
    %c0_i32_0 = arith.constant 0 : i32
    %c0_i32_1 = arith.constant 0 : i32
    return %c0_i32, %c0_i32_0 : i32, i32
  }
  func.func @transform_6(%arg0: i32) -> (i32, i32) {
    %c0_i32 = arith.constant 0 : i32
    %c0_i32_0 = arith.constant 0 : i32
    %c0_i32_1 = arith.constant 0 : i32
    return %c0_i32, %c0_i32_0 : i32, i32
  }
  func.func @transform_7(%arg0: i32) -> (i32, i32) {
    %c0_i32 = arith.constant 0 : i32
    %c0_i32_0 = arith.constant 0 : i32
    return %arg0, %c0_i32 : i32, i32
  }
}

</mosaic_0001>

<bundles_post_ra>
// kernel: tpu_custom_call.1
= control target key start
LH: loop header
LB: loop body
LE: loop exit
PB: predicated region body
PF: predicated region fallthrough
CT: control target
= control target key end

     0   :  { %v294_v0 = vmov 0   ;;  %v295_v2 = vmov 2   ;;  %v296_v3 = vmov 1   ;;  %v297_v4 = vmov 3   ;;  %s377_s0 = inlined_call_operand.vmem [shape: f32[8,4], index: 0, kind: input, shape index: {}]   ;;  %s378_s3 = inlined_call_operand.vmem [shape: f32[16,8], index: 3, kind: input, shape index: {}]   ;;  %s379_s1 = inlined_call_operand.vmem [shape: f32[4,16], index: 1, kind: input, shape index: {}]   ;;  %s380_s2 = inlined_call_operand.vmem [shape: f32[1,16], index: 2, kind: input, shape index: {}]   ;;  %s381_s5 = inlined_call_operand.vmem [shape: f32[8,8], index: 5, kind: input, shape index: {}]   ;;  %s382_s4 = inlined_call_operand.vmem [shape: f32[1,8], index: 4, kind: input, shape index: {}]   ;;  %s383_s6 = inlined_call_operand.vmem [shape: f32[1,3], index: 6, kind: input, shape index: {}]   ;;  %s384_s7 = inlined_call_operand.vmem [shape: f32[8,3], index: 7, kind: output, shape index: {}]  }
   0x1   :  { %289 = vset.pattern.permute.xlu0 %v294_v0  ;;  %v26_v1 = vld [vmem:[%s377_s0] sm:$0xff]  ;;  %291 = vset.pattern.permute.xlu1 %v295_v2  ;;  %v81_v6 = vld [vmem:[%s378_s3 + $0x8] sm:$0xff]  ;;  %v298_v8 = vmov 0.0|0.0   ;;  %vm299_vm0 = vmmov 0   ;;  %v300_v9 = vmov 0.0   ;;  %vm89_vm1 = vcmask 130048  }
   0x2   :  { %31 = vperm.xlu0 %289, %v26_v1   ;;  %59 = vperm.xlu1 %291, %v26_v1   ;;  %v80_v5 = vld [vmem:[%s378_s3] sm:$0xff]  ;;  %vm165_vm2 = vcmask 64512   ;;  %vm247_vm3 = vcmask 23552  }
   0x3   :  { %v280_v7 = vpack.c.bf16 %v81_v6, %v80_v5  ;;  %279 = vmatprep.subr.bf16.mxu0 %v298_v8  ;;  %271 = vmatprep.mubr.msk.f32.mxu0 %vm299_vm0, %v300_v9  ;;  %v253_v10 = vld [vmem:[%s379_s1] ss:$0 sm:$0xff]  ;;  %v255_v15 = vld [vmem:[%s379_s1 + $0x1] ss:$0 sm:$0xff]  ;;  %v256_v16 = vld [vmem:[%s379_s1 + $0x2] ss:$0 sm:$0xff] }
   0x4   :  { %274 = vmatprep.subr.mxu1 %v300_v9  ;;  %276 = vmatprep.mubr.msk.f32.mxu1 %vm299_vm0, %v300_v9  ;;  %v254_v14 = vld [vmem:[%s380_s2] ss:$0 sm:$0xff]  ;;  %v257_v18 = vld [vmem:[%s379_s1 + $0x3] ss:$0 sm:$0xff] }
   0x5   :  { %281 = vmatpush3.bf16.msra.mxu0 %v280_v7  ;;  %v164_v28 = vld [vmem:[%s381_s5] sm:$0xff] }
   0x6   :  { %290 = vset.pattern.permute.xlu0 %v296_v3  ;;  %292 = vset.pattern.permute.xlu1 %v297_v4  ;;  %v258_v29 = vld [vmem:[%s382_s4] ss:$0 sm:$0xff] }
   0x7   :  { %48 = vperm.xlu0 %290, %v26_v1   ;;  %70 = vperm.xlu1 %292, %v26_v1   ;;  %v261_v34 = vld [vmem:[%s383_s6] ss:$0 sm:$0xff] }
   0x8   :  { %275 = vmatpush3.msra.mxu1 %v164_v28 }
   0xb   :  { %293 = vset.pattern.permute.xlu0 %v297_v4 }
  0x81   :  { %v32_v11 = vpop.permute.xlu0 %31  ;;  %v60_v12 = vpop.permute.xlu1 %59 }
  0x82   :  { %v38_v13 = vmul.f32 %v253_v10, %v32_v11  ;;  %v66_v22 = vmul.f32 %v256_v16, %v60_v12 }
  0x84   :  { %v45_v20 = vadd.f32 %v254_v14, %v38_v13 }
  0x86   :  { %v49_v17 = vpop.permute.xlu0 %48  ;;  %v71_v19 = vpop.permute.xlu1 %70 }
  0x87   :  { %v55_v21 = vmul.f32 %v255_v15, %v49_v17  ;;  %v77_v24 = vmul.f32 %v257_v18, %v71_v19 }
  0x89   :  { %v56_v23 = vadd.f32 %v55_v21, %v45_v20 }
  0x8b   :  { %v67_v25 = vadd.f32 %v66_v22, %v56_v23 }
  0x8d   :  { %v78_v26 = vadd.f32 %v77_v24, %v67_v25 }
  0x8f   :  { %v79_v27 = vmax.f32 %v78_v26, 0.0 }
  0x91   :  { %272 = vmatmul.mubr.msk.f32.vlgmr.msra.gmra.mrb[0].mxu0 %vm89_vm1, %v79_v27 }
 0x164   :  { %v159_v30 = vpop.f32.mrb[0].mxu0 }
 0x165   :  { %v160_v31 = vadd.f32 %v258_v29, %v159_v30  ;;  %v273_v32 = vpop.f32.mrb[1].mxu0 }
 0x167   :  { %v163_v33 = vmax.f32 %v160_v31, 0.0 }
 0x169   :  { %277 = vmatmul.mubr.msk.f32.vlgmr.msra.gmra.mrb[0].mxu1 %vm165_vm2, %v163_v33 }
 0x23c   :  { %v235_v35 = vpop.f32.mrb[0].mxu1 }
 0x23d   :  { %v246_v36 = vadd.f32 %v261_v34, %v235_v35  ;;  %v278_v37 = vpop.f32.mrb[1].mxu1 }
 0x23f   :  { %248 = vst.msk [vmem:[%s384_s7] sm:$0xff] %vm247_vm3, %v246_v36 }

</bundles_post_ra>
